<compile_context>
chip_gen: v6e
topology: v6e:2x2x1
jax: 0.10.0
libtpu: 0.0.40
codegen_flags: <defaults>
</compile_context>

<pallas_src>
import numpy as np
import jax
import jax.numpy as jnp
from jax.experimental import pallas as pl
from jax.experimental.pallas import tpu as pltpu


def _round_up(x, m):
    return (x + m - 1) // m * m


# ---------------------------------------------------------------------------
# Stage 1: embedding gather + 2-layer single-timestep LSTM (runs exactly once).
# ---------------------------------------------------------------------------
def _frontend_kernel(ids_ref,              # SMEM (B_pad,) int32  (scalar prefetch)
                     table_ref,            # VMEM (V, E) f32
                     wih0_ref, b0_ref,     # VMEM (E, 4E) f32, (1, 4E) f32
                     wih1_ref, b1_ref,     # VMEM (E, 4E) f32, (1, 4E) f32
                     h2_ref,               # VMEM (B_pad, E) bf16 (output)
                     emb_buf):             # VMEM (B_pad, E) f32  (scratch)
    B_pad, E = emb_buf.shape

    # In-VMEM embedding gather: one dynamic sublane slice per batch row.
    for b in range(B_pad):
        emb_buf[pl.ds(b, 1), :] = table_ref[pl.ds(ids_ref[b], 1), :]
    emb = emb_buf[...]                                          # (B_pad, E) f32

    def lstm_cell(x, w_T_ref, b_ref):
        # x: (B_pad, E) f32; w_T_ref: (E, 4E) f32; b_ref: (1, 4E) = b_ih + b_hh.
        g = jnp.dot(x, w_T_ref[...], preferred_element_type=jnp.float32) + b_ref[...]
        i = jax.nn.sigmoid(g[:, 0 * E:1 * E])
        gg = jnp.tanh(g[:, 2 * E:3 * E])
        o = jax.nn.sigmoid(g[:, 3 * E:4 * E])
        # seq_len == 1 with zero initial (h, c): forget gate * c_prev == 0,
        # so c = i * tanh(g) exactly.  (Not valid for multi-step extensions.)
        return o * jnp.tanh(i * gg)

    h1 = lstm_cell(emb, wih0_ref, b0_ref)                       # layer 0
    h2 = lstm_cell(h1, wih1_ref, b1_ref)                        # layer 1
    h2_ref[...] = h2.astype(h2_ref.dtype)                       # bf16 for the MXU


# ---------------------------------------------------------------------------
# Stage 2: V-tiled decoder (Linear + Sigmoid).  Pure weight-streaming kernel.
# ---------------------------------------------------------------------------
def _decoder_kernel(h2_ref,                # VMEM (B_pad, E) bf16  (resident)
                    wdec_ref,              # VMEM (E, V_TILE) bf16 (streamed)
                    bdec_ref,              # VMEM (1, V_TILE) f32
                    out_ref):              # VMEM (B_pad, V_TILE) f32
    logits = jnp.dot(h2_ref[...], wdec_ref[...],
                     preferred_element_type=jnp.float32) + bdec_ref[...]
    out_ref[...] = jax.nn.sigmoid(logits)


def seq2seq_forward(x_ids, params, *, v_tile=1024):
    """x_ids: (B,) int32 token ids. Returns (B, len_token) float32."""
    B = x_ids.shape[0]
    table = params["embedding"].astype(jnp.float32)             # (V, E)
    V, E = table.shape

    B_pad = _round_up(max(B, 8), 8)
    v_tile = _round_up(min(v_tile, _round_up(V, 128)), 128)
    V_pad = _round_up(V, v_tile)
    num_v_tiles = V_pad // v_tile

    # LSTM weights stay f32 (tiny, resident); fuse the two bias vectors.
    wih0_T = params["w_ih_l0"].T.astype(jnp.float32)             # (E, 4E)
    b0 = (params["b_ih_l0"] + params["b_hh_l0"]).astype(jnp.float32).reshape(1, 4 * E)
    wih1_T = params["w_ih_l1"].T.astype(jnp.float32)             # (E, 4E)
    b1 = (params["b_ih_l1"] + params["b_hh_l1"]).astype(jnp.float32).reshape(1, 4 * E)

    # Decoder weight in bf16 (fed straight to the MXU), bias in f32, vocab padded
    # to a multiple of v_tile for lane-dense stores.
    wdec_T = jnp.zeros((E, V_pad), jnp.float32).at[:, :V].set(params["w_dec"].T)
    wdec_T = wdec_T.astype(jnp.bfloat16)                         # (E, V_pad)
    bdec = jnp.zeros((1, V_pad), jnp.float32).at[:, :V].set(params["b_dec"].reshape(1, V))

    # TODO(synk): torch ids are int64; truncated to int32 here (fine for real vocabs).
    ids = jnp.zeros((B_pad,), jnp.int32).at[:B].set(x_ids.astype(jnp.int32))

    # ---- Stage 1: gather + LSTM, executed once (hoisted out of the V loop) ----
    # TODO(synk): for very large vocabularies (table >> VMEM) switch the table to
    # memory_space=pl.ANY and gather rows with make_async_copy instead.
    h2 = pl.pallas_call(
        _frontend_kernel,
        out_shape=jax.ShapeDtypeStruct((B_pad, E), jnp.bfloat16),
        grid_spec=pltpu.PrefetchScalarGridSpec(
            num_scalar_prefetch=1,
            grid=(1,),
            in_specs=[
                pl.BlockSpec((V, E), lambda i, _ids: (0, 0)),        # embedding table
                pl.BlockSpec((E, 4 * E), lambda i, _ids: (0, 0)),    # W_ih l0 (transposed)
                pl.BlockSpec((1, 4 * E), lambda i, _ids: (0, 0)),    # fused bias l0
                pl.BlockSpec((E, 4 * E), lambda i, _ids: (0, 0)),    # W_ih l1 (transposed)
                pl.BlockSpec((1, 4 * E), lambda i, _ids: (0, 0)),    # fused bias l1
            ],
            out_specs=pl.BlockSpec((B_pad, E), lambda i, _ids: (0, 0)),
            scratch_shapes=[pltpu.VMEM((B_pad, E), jnp.float32)],
        ),
        compiler_params=pltpu.CompilerParams(
            dimension_semantics=("arbitrary",),
        ),
    )(ids, table, wih0_T, b0, wih1_T, b1)

    # ---- Stage 2: V-tiled decoder.  Per step: one bf16 MXU matmul + sigmoid ----
    out_padded = pl.pallas_call(
        _decoder_kernel,
        out_shape=jax.ShapeDtypeStruct((B_pad, V_pad), jnp.float32),
        grid_spec=pltpu.PrefetchScalarGridSpec(
            num_scalar_prefetch=0,
            grid=(num_v_tiles,),
            in_specs=[
                pl.BlockSpec((B_pad, E), lambda v: (0, 0)),          # h2 (resident)
                pl.BlockSpec((E, v_tile), lambda v: (0, v)),         # W_dec tile
                pl.BlockSpec((1, v_tile), lambda v: (0, v)),         # b_dec tile
            ],
            out_specs=pl.BlockSpec((B_pad, v_tile), lambda v: (0, v)),
        ),
        compiler_params=pltpu.CompilerParams(
            dimension_semantics=("parallel",),
        ),
    )(h2, wdec_T, bdec)

    return out_padded[:B, :V]


def _reference_forward(x_ids, params):
    """Pure-JAX f32 reference mirroring the PyTorch forward exactly."""
    table = params["embedding"]
    V, E = table.shape
    emb = table[x_ids]                                            # (B, E)

    def cell(x, w_ih, w_hh, b_ih, b_hh):
        h0 = jnp.zeros_like(x)
        c0 = jnp.zeros_like(x)
        g = x @ w_ih.T + b_ih + h0 @ w_hh.T + b_hh
        i = jax.nn.sigmoid(g[:, 0 * E:1 * E])
        f = jax.nn.sigmoid(g[:, 1 * E:2 * E])
        gg = jnp.tanh(g[:, 2 * E:3 * E])
        o = jax.nn.sigmoid(g[:, 3 * E:4 * E])
        c = f * c0 + i * gg
        return o * jnp.tanh(c)

    h1 = cell(emb, params["w_ih_l0"], params["w_hh_l0"],
              params["b_ih_l0"], params["b_hh_l0"])
    h2 = cell(h1, params["w_ih_l1"], params["w_hh_l1"],
              params["b_ih_l1"], params["b_hh_l1"])
    return jax.nn.sigmoid(h2 @ params["w_dec"].T + params["b_dec"])


def make_params(key, len_token, embedding_size):
    E, V = embedding_size, len_token
    ks = jax.random.split(key, 11)
    s = 1.0 / np.sqrt(E)
    u = lambda k, shape: jax.random.uniform(k, shape, jnp.float32, -s, s)
    return {
        "embedding": jax.random.normal(ks[0], (V, E), jnp.float32),
        "w_ih_l0": u(ks[1], (4 * E, E)),
        "w_hh_l0": u(ks[2], (4 * E, E)),
        "b_ih_l0": u(ks[3], (4 * E,)),
        "b_hh_l0": u(ks[4], (4 * E,)),
        "w_ih_l1": u(ks[5], (4 * E, E)),
        "w_hh_l1": u(ks[6], (4 * E, E)),
        "b_ih_l1": u(ks[7], (4 * E,)),
        "b_hh_l1": u(ks[8], (4 * E,)),
        "w_dec": u(ks[9], (V, E)),
        "b_dec": u(ks[10], (V,)),
    }


if __name__ == "__main__":
    LEN_TOKEN = 64      # vocabulary size
    EMBED = 32          # embedding / hidden size
    BATCH = 8

    key = jax.random.PRNGKey(0)
    pkey, xkey = jax.random.split(key)
    params = make_params(pkey, LEN_TOKEN, EMBED)
    x = jax.random.randint(xkey, (BATCH,), 0, LEN_TOKEN, dtype=jnp.int32)

    out = seq2seq_forward(x, params)
    out = jax.block_until_ready(out)

    ref = _reference_forward(x, params)
    # Only the decoder matmul runs in bf16 (h2 and W_dec); LSTM path is full f32,
    # so the comparison against the f32 reference is tight.
    np.testing.assert_allclose(np.asarray(out), np.asarray(ref),
                               rtol=1e-2, atol=1e-2)
    assert out.shape == (BATCH, LEN_TOKEN)
    print("KERNEL_OK")
</pallas_src>

<mosaic_0001>
module attributes {stable_mosaic.version = 11 : i64} {
  func.func @_frontend_kernel(%arg0: i32, %arg1: memref<8xi32, #tpu.memory_space<smem>>, %arg2: memref<64x32xf32, #tpu.memory_space<vmem>>, %arg3: memref<32x128xf32, #tpu.memory_space<vmem>>, %arg4: memref<1x128xf32, #tpu.memory_space<vmem>>, %arg5: memref<32x128xf32, #tpu.memory_space<vmem>>, %arg6: memref<1x128xf32, #tpu.memory_space<vmem>>, %arg7: memref<8x32xbf16, #tpu.memory_space<vmem>>, %arg8: memref<8x32xf32, #tpu.memory_space<vmem>>) attributes {dimension_semantics = [#tpu.dimension_semantics<arbitrary>], iteration_bounds = array<i64: 1>, scalar_prefetch = 1 : i64, scratch_operands = 1 : i64, tpu.core_type = #tpu.core_type<tc>, window_params = [{pipeline_mode = #tpu.pipeline_mode<synchronous>, transform_indices = @transform_0, window_bounds = array<i64: 64, 32>}, {pipeline_mode = #tpu.pipeline_mode<synchronous>, transform_indices = @transform_1, window_bounds = array<i64: 32, 128>}, {pipeline_mode = #tpu.pipeline_mode<synchronous>, transform_indices = @transform_2, window_bounds = array<i64: 1, 128>}, {pipeline_mode = #tpu.pipeline_mode<synchronous>, transform_indices = @transform_3, window_bounds = array<i64: 32, 128>}, {pipeline_mode = #tpu.pipeline_mode<synchronous>, transform_indices = @transform_4, window_bounds = array<i64: 1, 128>}, {pipeline_mode = #tpu.pipeline_mode<synchronous>, transform_indices = @transform_5, window_bounds = array<i64: 8, 32>}]} {
    %c0 = arith.constant 0 : index
    %0 = memref.load %arg1[%c0] : memref<8xi32, #tpu.memory_space<smem>>
    %1 = arith.index_cast %0 : i32 to index
    %c0_0 = arith.constant 0 : index
    %2 = vector.load %arg2[%1, %c0_0] : memref<64x32xf32, #tpu.memory_space<vmem>>, vector<1x32xf32>
    %c0_1 = arith.constant 0 : index
    %c0_2 = arith.constant 0 : index
    %3 = vector.load %arg8[%c0_1, %c0_2] : memref<8x32xf32, #tpu.memory_space<vmem>>, vector<1x32xf32>
    tpu.vector_store %arg8[%c0_1, %c0_2], %2 {strides = array<i32>} : memref<8x32xf32, #tpu.memory_space<vmem>>, vector<1x32xf32>,
    %c1 = arith.constant 1 : index
    %4 = memref.load %arg1[%c1] : memref<8xi32, #tpu.memory_space<smem>>
    %5 = arith.index_cast %4 : i32 to index
    %c0_3 = arith.constant 0 : index
    %6 = vector.load %arg2[%5, %c0_3] : memref<64x32xf32, #tpu.memory_space<vmem>>, vector<1x32xf32>
    %c1_4 = arith.constant 1 : index
    %c0_5 = arith.constant 0 : index
    %7 = vector.load %arg8[%c1_4, %c0_5] : memref<8x32xf32, #tpu.memory_space<vmem>>, vector<1x32xf32>
    tpu.vector_store %arg8[%c1_4, %c0_5], %6 {strides = array<i32>} : memref<8x32xf32, #tpu.memory_space<vmem>>, vector<1x32xf32>,
    %c2 = arith.constant 2 : index
    %8 = memref.load %arg1[%c2] : memref<8xi32, #tpu.memory_space<smem>>
    %9 = arith.index_cast %8 : i32 to index
    %c0_6 = arith.constant 0 : index
    %10 = vector.load %arg2[%9, %c0_6] : memref<64x32xf32, #tpu.memory_space<vmem>>, vector<1x32xf32>
    %c2_7 = arith.constant 2 : index
    %c0_8 = arith.constant 0 : index
    %11 = vector.load %arg8[%c2_7, %c0_8] : memref<8x32xf32, #tpu.memory_space<vmem>>, vector<1x32xf32>
    tpu.vector_store %arg8[%c2_7, %c0_8], %10 {strides = array<i32>} : memref<8x32xf32, #tpu.memory_space<vmem>>, vector<1x32xf32>,
    %c3 = arith.constant 3 : index
    %12 = memref.load %arg1[%c3] : memref<8xi32, #tpu.memory_space<smem>>
    %13 = arith.index_cast %12 : i32 to index
    %c0_9 = arith.constant 0 : index
    %14 = vector.load %arg2[%13, %c0_9] : memref<64x32xf32, #tpu.memory_space<vmem>>, vector<1x32xf32>
    %c3_10 = arith.constant 3 : index
    %c0_11 = arith.constant 0 : index
    %15 = vector.load %arg8[%c3_10, %c0_11] : memref<8x32xf32, #tpu.memory_space<vmem>>, vector<1x32xf32>
    tpu.vector_store %arg8[%c3_10, %c0_11], %14 {strides = array<i32>} : memref<8x32xf32, #tpu.memory_space<vmem>>, vector<1x32xf32>,
    %c4 = arith.constant 4 : index
    %16 = memref.load %arg1[%c4] : memref<8xi32, #tpu.memory_space<smem>>
    %17 = arith.index_cast %16 : i32 to index
    %c0_12 = arith.constant 0 : index
    %18 = vector.load %arg2[%17, %c0_12] : memref<64x32xf32, #tpu.memory_space<vmem>>, vector<1x32xf32>
    %c4_13 = arith.constant 4 : index
    %c0_14 = arith.constant 0 : index
    %19 = vector.load %arg8[%c4_13, %c0_14] : memref<8x32xf32, #tpu.memory_space<vmem>>, vector<1x32xf32>
    tpu.vector_store %arg8[%c4_13, %c0_14], %18 {strides = array<i32>} : memref<8x32xf32, #tpu.memory_space<vmem>>, vector<1x32xf32>,
    %c5 = arith.constant 5 : index
    %20 = memref.load %arg1[%c5] : memref<8xi32, #tpu.memory_space<smem>>
    %21 = arith.index_cast %20 : i32 to index
    %c0_15 = arith.constant 0 : index
    %22 = vector.load %arg2[%21, %c0_15] : memref<64x32xf32, #tpu.memory_space<vmem>>, vector<1x32xf32>
    %c5_16 = arith.constant 5 : index
    %c0_17 = arith.constant 0 : index
    %23 = vector.load %arg8[%c5_16, %c0_17] : memref<8x32xf32, #tpu.memory_space<vmem>>, vector<1x32xf32>
    tpu.vector_store %arg8[%c5_16, %c0_17], %22 {strides = array<i32>} : memref<8x32xf32, #tpu.memory_space<vmem>>, vector<1x32xf32>,
    %c6 = arith.constant 6 : index
    %24 = memref.load %arg1[%c6] : memref<8xi32, #tpu.memory_space<smem>>
    %25 = arith.index_cast %24 : i32 to index
    %c0_18 = arith.constant 0 : index
    %26 = vector.load %arg2[%25, %c0_18] : memref<64x32xf32, #tpu.memory_space<vmem>>, vector<1x32xf32>
    %c6_19 = arith.constant 6 : index
    %c0_20 = arith.constant 0 : index
    %27 = vector.load %arg8[%c6_19, %c0_20] : memref<8x32xf32, #tpu.memory_space<vmem>>, vector<1x32xf32>
    tpu.vector_store %arg8[%c6_19, %c0_20], %26 {strides = array<i32>} : memref<8x32xf32, #tpu.memory_space<vmem>>, vector<1x32xf32>,
    %c7 = arith.constant 7 : index
    %28 = memref.load %arg1[%c7] : memref<8xi32, #tpu.memory_space<smem>>
    %29 = arith.index_cast %28 : i32 to index
    %c0_21 = arith.constant 0 : index
    %30 = vector.load %arg2[%29, %c0_21] : memref<64x32xf32, #tpu.memory_space<vmem>>, vector<1x32xf32>
    %c7_22 = arith.constant 7 : index
    %c0_23 = arith.constant 0 : index
    %31 = vector.load %arg8[%c7_22, %c0_23] : memref<8x32xf32, #tpu.memory_space<vmem>>, vector<1x32xf32>
    tpu.vector_store %arg8[%c7_22, %c0_23], %30 {strides = array<i32>} : memref<8x32xf32, #tpu.memory_space<vmem>>, vector<1x32xf32>,
    %c0_24 = arith.constant 0 : index
    %c0_25 = arith.constant 0 : index
    %32 = vector.load %arg8[%c0_24, %c0_25] : memref<8x32xf32, #tpu.memory_space<vmem>>, vector<8x32xf32>
    %c0_26 = arith.constant 0 : index
    %c0_27 = arith.constant 0 : index
    %33 = vector.load %arg3[%c0_26, %c0_27] : memref<32x128xf32, #tpu.memory_space<vmem>>, vector<32x128xf32>
    %cst = arith.constant dense<0.000000e+00> : vector<8x128xf32>
    %34 = tpu.matmul %32, %33, %cst {dimension_numbers = #tpu.dot_dimension_numbers<[1], [0], [0], [1], [0, 0, 1, 1], [], []>} : vector<8x32xf32>, vector<32x128xf32>, vector<8x128xf32> -> vector<8x128xf32>
    %c0_28 = arith.constant 0 : index
    %c0_29 = arith.constant 0 : index
    %35 = vector.load %arg4[%c0_28, %c0_29] : memref<1x128xf32, #tpu.memory_space<vmem>>, vector<1x128xf32>
    %36 = vector.broadcast %35 : vector<1x128xf32> to vector<8x128xf32>
    %37 = arith.addf %34, %36 : vector<8x128xf32>
    %38 = vector.extract_strided_slice %37 {offsets = [0, 0], sizes = [8, 32], strides = [1, 1]} : vector<8x128xf32> to vector<8x32xf32>
    %39 = arith.negf %38 : vector<8x32xf32>
    %40 = math.exp %39 : vector<8x32xf32>
    %cst_30 = arith.constant 1.000000e+00 : f32
    %41 = vector.broadcast %cst_30 : f32 to vector<8x32xf32>
    %42 = arith.addf %41, %40 : vector<8x32xf32>
    %43 = arith.divf %41, %42 : vector<8x32xf32>
    %44 = vector.extract_strided_slice %37 {offsets = [0, 64], sizes = [8, 32], strides = [1, 1]} : vector<8x128xf32> to vector<8x32xf32>
    %45 = math.tanh %44 : vector<8x32xf32>
    %46 = vector.extract_strided_slice %37 {offsets = [0, 96], sizes = [8, 32], strides = [1, 1]} : vector<8x128xf32> to vector<8x32xf32>
    %47 = arith.negf %46 : vector<8x32xf32>
    %48 = math.exp %47 : vector<8x32xf32>
    %cst_31 = arith.constant 1.000000e+00 : f32
    %49 = vector.broadcast %cst_31 : f32 to vector<8x32xf32>
    %50 = arith.addf %49, %48 : vector<8x32xf32>
    %51 = arith.divf %49, %50 : vector<8x32xf32>
    %52 = arith.mulf %43, %45 : vector<8x32xf32>
    %53 = math.tanh %52 : vector<8x32xf32>
    %54 = arith.mulf %51, %53 : vector<8x32xf32>
    %c0_32 = arith.constant 0 : index
    %c0_33 = arith.constant 0 : index
    %55 = vector.load %arg5[%c0_32, %c0_33] : memref<32x128xf32, #tpu.memory_space<vmem>>, vector<32x128xf32>
    %cst_34 = arith.constant dense<0.000000e+00> : vector<8x128xf32>
    %56 = tpu.matmul %54, %55, %cst_34 {dimension_numbers = #tpu.dot_dimension_numbers<[1], [0], [0], [1], [0, 0, 1, 1], [], []>} : vector<8x32xf32>, vector<32x128xf32>, vector<8x128xf32> -> vector<8x128xf32>
    %c0_35 = arith.constant 0 : index
    %c0_36 = arith.constant 0 : index
    %57 = vector.load %arg6[%c0_35, %c0_36] : memref<1x128xf32, #tpu.memory_space<vmem>>, vector<1x128xf32>
    %58 = vector.broadcast %57 : vector<1x128xf32> to vector<8x128xf32>
    %59 = arith.addf %56, %58 : vector<8x128xf32>
    %60 = vector.extract_strided_slice %59 {offsets = [0, 0], sizes = [8, 32], strides = [1, 1]} : vector<8x128xf32> to vector<8x32xf32>
    %61 = arith.negf %60 : vector<8x32xf32>
    %62 = math.exp %61 : vector<8x32xf32>
    %cst_37 = arith.constant 1.000000e+00 : f32
    %63 = vector.broadcast %cst_37 : f32 to vector<8x32xf32>
    %64 = arith.addf %63, %62 : vector<8x32xf32>
    %65 = arith.divf %63, %64 : vector<8x32xf32>
    %66 = vector.extract_strided_slice %59 {offsets = [0, 64], sizes = [8, 32], strides = [1, 1]} : vector<8x128xf32> to vector<8x32xf32>
    %67 = math.tanh %66 : vector<8x32xf32>
    %68 = vector.extract_strided_slice %59 {offsets = [0, 96], sizes = [8, 32], strides = [1, 1]} : vector<8x128xf32> to vector<8x32xf32>
    %69 = arith.negf %68 : vector<8x32xf32>
    %70 = math.exp %69 : vector<8x32xf32>
    %cst_38 = arith.constant 1.000000e+00 : f32
    %71 = vector.broadcast %cst_38 : f32 to vector<8x32xf32>
    %72 = arith.addf %71, %70 : vector<8x32xf32>
    %73 = arith.divf %71, %72 : vector<8x32xf32>
    %74 = arith.mulf %65, %67 : vector<8x32xf32>
    %75 = math.tanh %74 : vector<8x32xf32>
    %76 = arith.mulf %73, %75 : vector<8x32xf32>
    %77 = arith.truncf %76 : vector<8x32xf32> to vector<8x32xbf16>
    %c0_39 = arith.constant 0 : index
    %c0_40 = arith.constant 0 : index
    %78 = vector.load %arg7[%c0_39, %c0_40] : memref<8x32xbf16, #tpu.memory_space<vmem>>, vector<8x32xbf16>
    tpu.vector_store %arg7[%c0_39, %c0_40], %77 {strides = array<i32>} : memref<8x32xbf16, #tpu.memory_space<vmem>>, vector<8x32xbf16>,
    return
  }
  func.func @transform_0(%arg0: i32, %arg1: memref<8xi32, #tpu.memory_space<smem>>) -> (i32, i32) {
    %c0_i32 = arith.constant 0 : i32
    %c0_i32_0 = arith.constant 0 : i32
    %c0_i32_1 = arith.constant 0 : i32
    return %c0_i32, %c0_i32_0 : i32, i32
  }
  func.func @transform_1(%arg0: i32, %arg1: memref<8xi32, #tpu.memory_space<smem>>) -> (i32, i32) {
    %c0_i32 = arith.constant 0 : i32
    %c0_i32_0 = arith.constant 0 : i32
    %c0_i32_1 = arith.constant 0 : i32
    return %c0_i32, %c0_i32_0 : i32, i32
  }
  func.func @transform_2(%arg0: i32, %arg1: memref<8xi32, #tpu.memory_space<smem>>) -> (i32, i32) {
    %c0_i32 = arith.constant 0 : i32
    %c0_i32_0 = arith.constant 0 : i32
    %c0_i32_1 = arith.constant 0 : i32
    return %c0_i32, %c0_i32_0 : i32, i32
  }
  func.func @transform_3(%arg0: i32, %arg1: memref<8xi32, #tpu.memory_space<smem>>) -> (i32, i32) {
    %c0_i32 = arith.constant 0 : i32
    %c0_i32_0 = arith.constant 0 : i32
    %c0_i32_1 = arith.constant 0 : i32
    return %c0_i32, %c0_i32_0 : i32, i32
  }
  func.func @transform_4(%arg0: i32, %arg1: memref<8xi32, #tpu.memory_space<smem>>) -> (i32, i32) {
    %c0_i32 = arith.constant 0 : i32
    %c0_i32_0 = arith.constant 0 : i32
    %c0_i32_1 = arith.constant 0 : i32
    return %c0_i32, %c0_i32_0 : i32, i32
  }
  func.func @transform_5(%arg0: i32, %arg1: memref<8xi32, #tpu.memory_space<smem>>) -> (i32, i32) {
    %c0_i32 = arith.constant 0 : i32
    %c0_i32_0 = arith.constant 0 : i32
    %c0_i32_1 = arith.constant 0 : i32
    return %c0_i32, %c0_i32_0 : i32, i32
  }
}

</mosaic_0001>

<bundles_post_ra>
// kernel: tpu_custom_call.1
= control target key start
LH: loop header
LB: loop body
LE: loop exit
PB: predicated region body
PF: predicated region fallthrough
CT: control target
= control target key end

     0   :  { %s530_s0 = inlined_call_operand.vmem [shape: s32[8], index: 0, kind: input, shape index: {}]   ;;  %s531_s1 = inlined_call_operand.vmem [shape: f32[64,32], index: 1, kind: input, shape index: {}]   ;;  %s532_s2 = inlined_call_operand.vmem [shape: f32[32,128], index: 2, kind: input, shape index: {}]   ;;  %s533_s3 = inlined_call_operand.vmem [shape: f32[1,128], index: 3, kind: input, shape index: {}]   ;;  %s534_s4 = inlined_call_operand.vmem [shape: f32[32,128], index: 4, kind: input, shape index: {}]   ;;  %s535_s5 = inlined_call_operand.vmem [shape: f32[1,128], index: 5, kind: input, shape index: {}]   ;;  %s536_s6 = inlined_call_operand.hbm [shape: bf16[8,32], index: 6, kind: output, shape index: {}]  }
   0x1   :  { %s11_s23 = sshll.u32 %s530_s0, 4  ;;  %s12_s23 = int_to_ptr.vmem [resolvable:$true] %s11_s23 }
   0x2   :  { %s370_s24 = scalar_lea.vmem %s12_s23, 16  ;;  %p375_p1 = scmp.lt.s32.totalorder %s12_s23, %s12_s23 }
   0x3   :  { %p371_p0 = scmp.ne.s32.totalorder %s12_s23, %s370_s24  ;;  %p376_p2 = scmp.lt.s32.totalorder %s370_s24, %s370_s24 }
   0x5   :  { %p377_p3 = por %p376_p2, %p375_p1 }
   0x7   :  { %p378_p4 = pnand %p377_p3, %p371_p0 }
   0x9   :  { %381 = shalt.err (!%p378_p4)  }
   0xa   :  { %s406_s25 = smov [#allocation4]  }
   0xb   :  { %14 = dma.vmem_to_smem %s12_s23, 16, %s406_s25, [#allocation3] }
   0xc   :  { %402 = dma.done.wait [#allocation3], 16 }
   0xd   :  { %403 = vsyncadd [#allocation3], 4294967280 }
   0xe   :  { %16 = sfence }
   0xf   :  { %v65_v0 = vld [vmem:[%s532_s2 + $0x18] sm:$0xff]  ;;  %v407_v1 = vmov 0.0   ;;  %v64_v2 = vld [vmem:[%s532_s2 + $0x10] sm:$0xff]  ;;  %vm408_vm0 = vmmov 0   ;;  %s28_s29 = sld [smem:[#allocation4]] }
  0x10   :  { %325 = vmatprep.subr.mxu0 %v407_v1  ;;  %333 = vmatprep.mubr.msk.f32.mxu0 %vm408_vm0, %v407_v1  ;;  %s300_s30 = sld [smem:[#allocation4 + $0x1]] }
  0x11   :  { %326 = vmatpush3.msra.mxu0 %v65_v0  ;;  %336 = vmatprep.subr.mxu1 %v407_v1 }
  0x12   :  { %17 = vsyncpa [#allocation6], 0  ;;  %327 = vmatprep.subr.mxu0 %v407_v1  ;;  %v63_v3 = vld [vmem:[%s532_s2 + $0x8] sm:$0xff]  ;;  %s301_s9 = sld [smem:[#allocation4 + $0x2]]  ;;  %344 = vmatprep.mubr.msk.f32.mxu1 %vm408_vm0, %v407_v1  ;;  %v62_v4 = vld [vmem:[%s532_s2] sm:$0xff]  ;;  %vm31_vm1 = vcmask 253952  }
  0x13   :  { %328 = vmatpush3.msra.mxu0 %v64_v2  ;;  %s302_s10 = sld [smem:[#allocation4 + $0x3]]  ;;  %vm73_vm2 = vcmask 261120   ;;  %v307_v14 = vld [vmem:[%s533_s3] ss:$0 sm:$0xff]  ;;  %v168_v25 = vld [vmem:[%s534_s4 + $0x18] sm:$0xff]  ;;  %v167_v26 = vld [vmem:[%s534_s4 + $0x10] sm:$0xff] }
  0x14   :  { %329 = vmatprep.subr.mxu0 %v407_v1  ;;  %s303_s13 = sld [smem:[#allocation4 + $0x4]]  ;;  %337 = vmatpush3.msra.mxu1 %v168_v25  ;;  %v166_v27 = vld [vmem:[%s534_s4 + $0x8] sm:$0xff]  ;;  %v165_v28 = vld [vmem:[%s534_s4] sm:$0xff]  ;;  %s410_s23 = smov 96   ;;  %vm276_vm3 = vcmask 257024  }
  0x15   :  { %330 = vmatpush3.msra.mxu0 %v63_v3  ;;  %s304_s14 = sld [smem:[#allocation4 + $0x5]]  ;;  %s29_s17 = scalar_lea.vmem %s531_s1, %s28_s29  ;;  %338 = vmatprep.subr.mxu1 %v407_v1  ;;  %v310_v33 = vld [vmem:[%s535_s5] ss:$0 sm:$0xff] }
  0x16   :  { %331 = vmatprep.subr.mxu0 %v407_v1  ;;  %s305_s18 = sld [smem:[#allocation4 + $0x6]]  ;;  %v30_v5 = vld [vmem:[%s29_s17] sm:$0x1]  ;;  %s34_s21 = scalar_lea.vmem %s531_s1, %s300_s30  ;;  %339 = vmatpush3.msra.mxu1 %v167_v26 }
  0x17   :  { %332 = vmatpush3.msra.mxu0 %v62_v4  ;;  %s306_s22 = sld [smem:[#allocation4 + $0x7]]  ;;  %32 = vst.msk [vmem:[#allocation2] sm:$0x1] %vm31_vm1, %v30_v5  ;;  %v35_v6 = vld [vmem:[%s34_s21] sm:$0x1]  ;;  %s409_s17 = smov 64   ;;  %340 = vmatprep.subr.mxu1 %v407_v1 }
  0x18   :  { %s38_s24 = scalar_lea.vmem %s531_s1, %s301_s9  ;;  %36 = vst.msk [vmem:[#allocation2 + $0x1] sm:$0x1] %vm31_vm1, %v35_v6  ;;  %341 = vmatpush3.msra.mxu1 %v166_v27  ;;  %s412_s4 = smov [#allocation5]  }
  0x19   :  { %v39_v7 = vld [vmem:[%s38_s24] sm:$0x1]  ;;  %s42_s27 = scalar_lea.vmem %s531_s1, %s302_s10  ;;  %342 = vmatprep.subr.mxu1 %v407_v1  ;;  %s411_s24 = smov 32  }
  0x1a   :  { %40 = vst.msk [vmem:[#allocation2 + $0x2] sm:$0x1] %vm31_vm1, %v39_v7  ;;  %v43_v8 = vld [vmem:[%s42_s27] sm:$0x1]  ;;  %s46_s29 = scalar_lea.vmem %s531_s1, %s303_s13  ;;  %343 = vmatpush3.msra.mxu1 %v165_v28  ;;  %s284_s5 = sshll.u32 %s412_s4, 4  ;;  %s285_s5 = int_to_ptr.vmem [resolvable:$true] %s284_s5 }
  0x1b   :  { %44 = vst.msk [vmem:[#allocation2 + $0x3] sm:$0x1] %vm31_vm1, %v43_v8  ;;  %v47_v9 = vld [vmem:[%s46_s29] sm:$0x1]  ;;  %s50_s8 = scalar_lea.vmem %s531_s1, %s304_s14  ;;  %s382_s27 = scalar_lea.vmem %s285_s5, 64 }
  0x1c   :  { %48 = vst.msk [vmem:[#allocation2 + $0x4] sm:$0x1] %vm31_vm1, %v47_v9  ;;  %v51_v10 = vld [vmem:[%s50_s8] sm:$0x1]  ;;  %s54_s10 = scalar_lea.vmem %s531_s1, %s305_s18  ;;  %p383_p5 = scmp.ne.s32.totalorder %s285_s5, %s382_s27 }
  0x1d   :  { %52 = vst.msk [vmem:[#allocation2 + $0x5] sm:$0x1] %vm31_vm1, %v51_v10  ;;  %v55_v11 = vld [vmem:[%s54_s10] sm:$0x1]  ;;  %s58_s13 = scalar_lea.vmem %s531_s1, %s306_s22  ;;  %p387_p6 = scmp.lt.s32.totalorder %s285_s5, %s285_s5 }
  0x1e   :  { %56 = vst.msk [vmem:[#allocation2 + $0x6] sm:$0x1] %vm31_vm1, %v55_v11  ;;  %v59_v12 = vld [vmem:[%s58_s13] sm:$0x1]  ;;  %p388_p7 = scmp.lt.s32.totalorder %s382_s27, %s382_s27 }
  0x1f   :  { %60 = vst.msk [vmem:[#allocation2 + $0x7] sm:$0x1] %vm31_vm1, %v59_v12 }
  0x20   :  { %p389_p8 = por %p388_p7, %p387_p6 }
  0x22   :  { %p390_p9 = pnand %p389_p8, %p383_p5 }
  0x26   :  { %v61_v13 = vld [vmem:[#allocation2] sm:$0xff] }
  0x27   :  { %334 = vmatmul.mubr.msk.f32.vlgmr.msra.gmra.mxu0 %vm73_vm2, %v61_v13 }
  0xe7   :  { %v143_v15 = vpop.f32.mrf.mxu0 }
  0xe8   :  { %v144_v16 = vadd.f32 %v307_v14, %v143_v15 }
  0xe9   :  { %v335_v17 = vpop.f32.mrf.mxu0 }
  0xea   :  { %354 = vtanh.f32 %v144_v16  ;;  %v309_v19 = vmul.f32 -1.442695, %v144_v16 }
  0xec   :  { %356 = vpow2.f32 %v309_v19 }
  0xf7   :  { %v355_v18 = vpop.eup %354 }
  0xf8   :  { %155 = vrot.lane.b32.xlu0 %v355_v18, %s409_s17 }
  0xf9   :  { %v357_v20 = vpop.eup %356 }
  0xfa   :  { %v150_v21 = vadd.f32 1.0, %v357_v20 }
  0xfc   :  { %358 = vrcp.f32 %v150_v21 }
 0x109   :  { %v359_v22 = vpop.eup %358 }
 0x16a   :  { %v156_v23 = vpop.permute.xlu0 %155 }
 0x16b   :  { %v158_v24 = vmul.f32 %v359_v22, %v156_v23 }
 0x16d   :  { %360 = vtanh.f32 %v158_v24 }
 0x17a   :  { %v361_v29 = vpop.eup %360 }
 0x17b   :  { %161 = vrot.lane.b32.xlu0 %v361_v29, %s410_s23 }
 0x1ed   :  { %v162_v30 = vpop.permute.xlu0 %161 }
 0x1ee   :  { %v164_v31 = vmul.f32 %v359_v22, %v162_v30 }
 0x1f0   :  { %177 = vrot.lane.b32.xlu1 %v164_v31, %s411_s24 }
 0x262   :  { %v178_v32 = vpop.permute.xlu1 %177 }
 0x263   :  { %345 = vmatmul.mubr.msk.f32.vlgmr.msra.gmra.mxu1 %vm73_vm2, %v178_v32 }
 0x323   :  { %v247_v34 = vpop.f32.mrf.mxu1 }
 0x324   :  { %v248_v35 = vadd.f32 %v310_v33, %v247_v34 }
 0x325   :  { %v346_v36 = vpop.f32.mrf.mxu1 }
 0x326   :  { %362 = vtanh.f32 %v248_v35  ;;  %v312_v38 = vmul.f32 -1.442695, %v248_v35 }
 0x328   :  { %364 = vpow2.f32 %v312_v38 }
 0x333   :  { %v363_v37 = vpop.eup %362 }
 0x334   :  { %259 = vrot.lane.b32.xlu1 %v363_v37, %s409_s17 }
 0x335   :  { %v365_v39 = vpop.eup %364 }
 0x336   :  { %v254_v40 = vadd.f32 1.0, %v365_v39 }
 0x338   :  { %366 = vrcp.f32 %v254_v40 }
 0x345   :  { %v367_v41 = vpop.eup %366 }
 0x3a6   :  { %v260_v42 = vpop.permute.xlu1 %259 }
 0x3a7   :  { %v262_v43 = vmul.f32 %v367_v41, %v260_v42 }
 0x3a9   :  { %368 = vtanh.f32 %v262_v43 }
 0x3b6   :  { %v369_v44 = vpop.eup %368 }
 0x3b7   :  { %265 = vrot.lane.b32.xlu0 %v369_v44, %s410_s23 }
 0x429   :  { %v266_v45 = vpop.permute.xlu0 %265 }
 0x42a   :  { %v268_v46 = vmul.f32 %v367_v41, %v266_v45 }
 0x42c   :  { %v314_v47 = vpack.c.bf16 %v268_v46, %v268_v46 }
 0x42e   :  { %273 = vrot.lane.b32.xlu1 %v314_v47, %s411_s24 }
 0x4a0   :  { %v274_v48 = vpop.permute.xlu1 %273 }
 0x4a1   :  { %277 = vst.msk [vmem:[#allocation5] sm:$0xf] %vm276_vm3, %v274_v48 }
 0x4a2   :  { %393 = shalt.err (!%p390_p9)
}
 0x4a3   :  { %287 = dma.vmem_to_hbm [thread:$0]  %s285_s5, 64, %s536_s6, [#allocation6]  }
 0x4a4   :  { %404 = dma.done.wait [#allocation6], 64  }
 0x4a5   :  { %405 = vsyncadd [#allocation6], 4294967232 }
 0x4a6   :  { %291 = vsyncpa [#allocation6], 1 }

</bundles_post_ra>
